<compile_context>
chip_gen: v7x
topology: tpu7x:2x2x1
jax: 0.10.0
libtpu: 0.0.40
codegen_flags: <defaults>
</compile_context>

<pallas_src>
import math

import jax
import jax.numpy as jnp
from jax.experimental import pallas as pl
from jax.experimental.pallas import tpu as pltpu


_SUB_M = 128      # rows per in-kernel sub-block (sublane axis)
_STRIPE = 128     # lanes per in-kernel column stripe (one vreg width)
_ACC_GROUP = 8    # low-precision partials summed before f32 accumulation


def _round_up(a, b):
    return ((a + b - 1) // b) * b


def _pick_tile(size, max_tile, align):
    """Largest tile <= max_tile (multiple of `align`) that minimizes padding."""
    size = max(int(size), 1)
    n_tiles = pl.cdiv(size, max_tile)
    return _round_up(pl.cdiv(size, n_tiles), align)


def _l1_kernel(x_ref, yt_ref, o_ref):
    """One (tm, tn) output tile of pairwise L1 distances.

    x_ref : (tm, D)   query rows (compute dtype)
    yt_ref: (D, tn)   transposed points: each feature row is lane-dense
    o_ref : (tm, tn)  output tile

    The D-reduction runs fully in vregs on (rows, 128) stripes: acc is 16
    vregs at rows=128, plus one diff temp and the small x / y^T stripe loads,
    comfortably inside the 64-entry vreg file (no spill vld/vst traffic).
    """
    tm, d_dim = x_ref.shape
    tn = o_ref.shape[1]
    low_precision = x_ref.dtype != jnp.float32

    # D is a small compile-time constant here (<=64), so plain Python loops
    # (fully unrolled) are fine; switch to lax.fori_loop(unroll=k) if D grows.
    for mi in range(0, tm, _SUB_M):
        rows = min(_SUB_M, tm - mi)
        x_chunk = x_ref[mi:mi + rows, :]                       # (rows, D)
        for ns in range(0, tn, _STRIPE):
            y_stripe = yt_ref[:, ns:ns + _STRIPE]              # (D, 128) lane-dense

            acc = jnp.zeros((rows, _STRIPE), jnp.float32)
            if not low_precision:
                # f32 path (all generations): pure VPU abs+add into the acc.
                for d in range(d_dim):
                    acc = acc + jnp.abs(x_chunk[:, d:d + 1] - y_stripe[d:d + 1, :])
            else:
                # bf16 path (v6e/v7x packed VPU): sub/abs and short partial
                # sums in bf16, then upconvert into the f32 accumulator.
                for d0 in range(0, d_dim, _ACC_GROUP):
                    hi = min(d0 + _ACC_GROUP, d_dim)
                    part = jnp.abs(x_chunk[:, d0:d0 + 1] - y_stripe[d0:d0 + 1, :])
                    for d in range(d0 + 1, hi):
                        part = part + jnp.abs(x_chunk[:, d:d + 1] - y_stripe[d:d + 1, :])
                    acc = acc + part.astype(jnp.float32)

            # TODO(synk): verify in the bundle dump that the per-d lane splat of
            # x_chunk[:, d:d+1] does not land on VALU; if it does, splat via an
            # idle-MXU rank-1 matmul (x_col @ ones(1, 128)) instead.
            o_ref[mi:mi + rows, ns:ns + _STRIPE] = acc.astype(o_ref.dtype)


def prepare_points_t(points, *, tn_max=512, compute_dtype=jnp.float32):
    """Transpose + cast + pad the static point set once (hoisted out of forward).

    Returns (points_T padded to (D, n_pad), tn) with tn a multiple of 128.
    """
    n = points.shape[0]
    tn = _pick_tile(n, tn_max, 128)
    n_pad = _round_up(n, tn)
    yt = points.T.astype(compute_dtype)                        # (D, N): lane-dense rows
    if n_pad != n:
        yt = jnp.pad(yt, ((0, 0), (0, n_pad - n)))
    return yt, tn


def l1_pairwise_from_prepared(x, yt, n_valid, tn, *,
                              tm_max=256, compute_dtype=jnp.float32,
                              out_dtype=jnp.float32):
    """x: (M, D) queries, yt: (D, n_pad) prepared points^T -> (M, n_valid) L1 dists."""
    m, d = x.shape
    d2, n_pad = yt.shape
    assert d == d2 and n_pad % tn == 0

    tm = _pick_tile(m, tm_max, 8)
    m_pad = _round_up(m, tm)
    x = x.astype(compute_dtype)
    if m_pad != m:
        x = jnp.pad(x, ((0, m_pad - m), (0, 0)))

    # Grid ordered (j outer, i inner): the y^T tile (the larger per-step
    # operand) has a constant block index across the inner i sweep, so each
    # y^T column tile is DMA'd exactly once; only the tiny x tile re-streams.
    grid = (n_pad // tn, m_pad // tm)

    out = pl.pallas_call(
        _l1_kernel,
        out_shape=jax.ShapeDtypeStruct((m_pad, n_pad), out_dtype),
        grid_spec=pltpu.PrefetchScalarGridSpec(
            num_scalar_prefetch=0,
            grid=grid,
            in_specs=[
                pl.BlockSpec((tm, d), lambda j, i: (i, 0)),   # query rows, full D
                pl.BlockSpec((d, tn), lambda j, i: (0, j)),   # points^T column tile
            ],
            out_specs=pl.BlockSpec((tm, tn), lambda j, i: (i, j)),
        ),
        compiler_params=pltpu.CompilerParams(
            # D is reduced in-kernel: both grid axes are independent output
            # tiles, so megacore (v7x: 2 TCs) can shard either axis.
            dimension_semantics=("parallel", "parallel"),
            vmem_limit_bytes=32 * 1024 * 1024,
        ),
    )(x, yt)
    return out[:m, :n_valid]


def l1_pairwise_distance(x, y, *, tm_max=256, tn_max=512,
                         compute_dtype=jnp.float32, out_dtype=jnp.float32):
    """Convenience wrapper: x (M, D), y (N, D) -> (M, N) pairwise L1 distances."""
    yt, tn = prepare_points_t(y, tn_max=tn_max, compute_dtype=compute_dtype)
    return l1_pairwise_from_prepared(
        x, yt, y.shape[0], tn,
        tm_max=tm_max, compute_dtype=compute_dtype, out_dtype=out_dtype)


class L1Geometry:
    """JAX mirror of HSGembedding.geometries.L1 (forward pass only)."""

    def __init__(self, n, dim, key, init=None, *,
                 compute_dtype=jnp.float32, out_dtype=jnp.float32,
                 tm_max=256, tn_max=512):
        if init is None:
            stdv = 1.0 / math.sqrt(dim)
            self.points = stdv * jax.random.normal(key, (n, dim), dtype=jnp.float32)
        else:
            self.points = jnp.asarray(init, dtype=jnp.float32)
        self._compute_dtype = compute_dtype
        self._out_dtype = out_dtype
        self._tm_max = tm_max
        # points is static across calls: cache the transposed / cast / padded
        # (D, n_pad) layout so forward() never repeats that HBM pass.
        self._yt, self._tn = prepare_points_t(
            self.points, tn_max=tn_max, compute_dtype=compute_dtype)

    def forward(self, idx):
        # TODO(synk): the points[idx] gather stays as plain-JAX glue; it could be
        # fused via PrefetchScalarGridSpec(num_scalar_prefetch=1) + pl.Element rows.
        x = self.points[idx]                                   # (M, D)
        return l1_pairwise_from_prepared(
            x, self._yt, self.points.shape[0], self._tn,
            tm_max=self._tm_max, compute_dtype=self._compute_dtype,
            out_dtype=self._out_dtype)


def _ref_l1(x, y):
    return jnp.sum(jnp.abs(x[:, None, :] - y[None, :, :]), axis=2)


if __name__ == "__main__":
    key = jax.random.PRNGKey(0)

    # --- primary demo: the original module's toy sizes (f32 path) ----------
    n, dim = 8, 32
    geom = L1Geometry(n, dim, key)
    idx = jnp.array([0, 3, 5, 7], dtype=jnp.int32)
    out = jax.block_until_ready(geom.forward(idx))
    ref = _ref_l1(geom.points[idx], geom.points)
    assert out.shape == (idx.shape[0], n)
    assert jnp.allclose(out, ref, atol=1e-4, rtol=1e-4)

    # --- padding + multi row-chunk / multi stripe path (f32) ---------------
    k1, k2, k3 = jax.random.split(key, 3)
    n2, dim2, m2 = 300, 16, 150
    geom2 = L1Geometry(n2, dim2, k1)
    idx2 = jax.random.randint(k2, (m2,), 0, n2, dtype=jnp.int32)
    out2 = jax.block_until_ready(geom2.forward(idx2))
    ref2 = _ref_l1(geom2.points[idx2], geom2.points)
    assert out2.shape == (m2, n2)
    assert jnp.allclose(out2, ref2, atol=1e-4, rtol=1e-4)

    # --- multi-tile 2-D grid (small tiles forced) + f32 path ----------------
    geom2b = L1Geometry(n2, dim2, k1, tm_max=64, tn_max=128)
    out2b = jax.block_until_ready(geom2b.forward(idx2))
    assert jnp.allclose(out2b, ref2, atol=1e-4, rtol=1e-4)

    # --- bf16 inner-compute path (v6e/v7x packed VPU; f32 accumulation) ----
    n3, dim3, m3 = 384, 32, 96
    geom3 = L1Geometry(n3, dim3, k3, compute_dtype=jnp.bfloat16)
    idx3 = jnp.arange(m3, dtype=jnp.int32)
    out3 = jax.block_until_ready(geom3.forward(idx3))
    ref3 = _ref_l1(geom3.points[idx3], geom3.points)
    assert out3.shape == (m3, n3)
    assert jnp.allclose(out3, ref3, atol=5e-2, rtol=5e-2)

    print("KERNEL_OK")
</pallas_src>

<mosaic_0001>
module attributes {stable_mosaic.version = 11 : i64} {
  func.func @_l1_kernel(%arg0: i32, %arg1: i32, %arg2: memref<8x32xf32, #tpu.memory_space<vmem>>, %arg3: memref<32x128xf32, #tpu.memory_space<vmem>>, %arg4: memref<8x128xf32, #tpu.memory_space<vmem>>) attributes {dimension_semantics = [#tpu.dimension_semantics<parallel>, #tpu.dimension_semantics<parallel>], iteration_bounds = array<i64: 1, 1>, scalar_prefetch = 0 : i64, scratch_operands = 0 : i64, tpu.core_type = #tpu.core_type<tc>, window_params = [{transform_indices = @transform_0, window_bounds = array<i64: 8, 32>}, {transform_indices = @transform_1, window_bounds = array<i64: 32, 128>}, {transform_indices = @transform_2, window_bounds = array<i64: 8, 128>}]} {
    %c0 = arith.constant 0 : index
    %c0_0 = arith.constant 0 : index
    %0 = vector.load %arg2[%c0, %c0_0] : memref<8x32xf32, #tpu.memory_space<vmem>>, vector<8x32xf32>
    %c0_1 = arith.constant 0 : index
    %c0_2 = arith.constant 0 : index
    %1 = vector.load %arg3[%c0_1, %c0_2] : memref<32x128xf32, #tpu.memory_space<vmem>>, vector<32x128xf32>
    %cst = arith.constant 0.000000e+00 : f32
    %2 = vector.broadcast %cst : f32 to vector<8x128xf32>
    %3 = vector.extract_strided_slice %0 {offsets = [0, 0], sizes = [8, 1], strides = [1, 1]} : vector<8x32xf32> to vector<8x1xf32>
    %4 = vector.extract_strided_slice %1 {offsets = [0, 0], sizes = [1, 128], strides = [1, 1]} : vector<32x128xf32> to vector<1x128xf32>
    %5 = vector.broadcast %3 : vector<8x1xf32> to vector<8x128xf32>
    %6 = vector.broadcast %4 : vector<1x128xf32> to vector<8x128xf32>
    %7 = arith.subf %5, %6 : vector<8x128xf32>
    %8 = math.absf %7 : vector<8x128xf32>
    %9 = arith.addf %2, %8 : vector<8x128xf32>
    %10 = vector.extract_strided_slice %0 {offsets = [0, 1], sizes = [8, 1], strides = [1, 1]} : vector<8x32xf32> to vector<8x1xf32>
    %11 = vector.extract_strided_slice %1 {offsets = [1, 0], sizes = [1, 128], strides = [1, 1]} : vector<32x128xf32> to vector<1x128xf32>
    %12 = vector.broadcast %10 : vector<8x1xf32> to vector<8x128xf32>
    %13 = vector.broadcast %11 : vector<1x128xf32> to vector<8x128xf32>
    %14 = arith.subf %12, %13 : vector<8x128xf32>
    %15 = math.absf %14 : vector<8x128xf32>
    %16 = arith.addf %9, %15 : vector<8x128xf32>
    %17 = vector.extract_strided_slice %0 {offsets = [0, 2], sizes = [8, 1], strides = [1, 1]} : vector<8x32xf32> to vector<8x1xf32>
    %18 = vector.extract_strided_slice %1 {offsets = [2, 0], sizes = [1, 128], strides = [1, 1]} : vector<32x128xf32> to vector<1x128xf32>
    %19 = vector.broadcast %17 : vector<8x1xf32> to vector<8x128xf32>
    %20 = vector.broadcast %18 : vector<1x128xf32> to vector<8x128xf32>
    %21 = arith.subf %19, %20 : vector<8x128xf32>
    %22 = math.absf %21 : vector<8x128xf32>
    %23 = arith.addf %16, %22 : vector<8x128xf32>
    %24 = vector.extract_strided_slice %0 {offsets = [0, 3], sizes = [8, 1], strides = [1, 1]} : vector<8x32xf32> to vector<8x1xf32>
    %25 = vector.extract_strided_slice %1 {offsets = [3, 0], sizes = [1, 128], strides = [1, 1]} : vector<32x128xf32> to vector<1x128xf32>
    %26 = vector.broadcast %24 : vector<8x1xf32> to vector<8x128xf32>
    %27 = vector.broadcast %25 : vector<1x128xf32> to vector<8x128xf32>
    %28 = arith.subf %26, %27 : vector<8x128xf32>
    %29 = math.absf %28 : vector<8x128xf32>
    %30 = arith.addf %23, %29 : vector<8x128xf32>
    %31 = vector.extract_strided_slice %0 {offsets = [0, 4], sizes = [8, 1], strides = [1, 1]} : vector<8x32xf32> to vector<8x1xf32>
    %32 = vector.extract_strided_slice %1 {offsets = [4, 0], sizes = [1, 128], strides = [1, 1]} : vector<32x128xf32> to vector<1x128xf32>
    %33 = vector.broadcast %31 : vector<8x1xf32> to vector<8x128xf32>
    %34 = vector.broadcast %32 : vector<1x128xf32> to vector<8x128xf32>
    %35 = arith.subf %33, %34 : vector<8x128xf32>
    %36 = math.absf %35 : vector<8x128xf32>
    %37 = arith.addf %30, %36 : vector<8x128xf32>
    %38 = vector.extract_strided_slice %0 {offsets = [0, 5], sizes = [8, 1], strides = [1, 1]} : vector<8x32xf32> to vector<8x1xf32>
    %39 = vector.extract_strided_slice %1 {offsets = [5, 0], sizes = [1, 128], strides = [1, 1]} : vector<32x128xf32> to vector<1x128xf32>
    %40 = vector.broadcast %38 : vector<8x1xf32> to vector<8x128xf32>
    %41 = vector.broadcast %39 : vector<1x128xf32> to vector<8x128xf32>
    %42 = arith.subf %40, %41 : vector<8x128xf32>
    %43 = math.absf %42 : vector<8x128xf32>
    %44 = arith.addf %37, %43 : vector<8x128xf32>
    %45 = vector.extract_strided_slice %0 {offsets = [0, 6], sizes = [8, 1], strides = [1, 1]} : vector<8x32xf32> to vector<8x1xf32>
    %46 = vector.extract_strided_slice %1 {offsets = [6, 0], sizes = [1, 128], strides = [1, 1]} : vector<32x128xf32> to vector<1x128xf32>
    %47 = vector.broadcast %45 : vector<8x1xf32> to vector<8x128xf32>
    %48 = vector.broadcast %46 : vector<1x128xf32> to vector<8x128xf32>
    %49 = arith.subf %47, %48 : vector<8x128xf32>
    %50 = math.absf %49 : vector<8x128xf32>
    %51 = arith.addf %44, %50 : vector<8x128xf32>
    %52 = vector.extract_strided_slice %0 {offsets = [0, 7], sizes = [8, 1], strides = [1, 1]} : vector<8x32xf32> to vector<8x1xf32>
    %53 = vector.extract_strided_slice %1 {offsets = [7, 0], sizes = [1, 128], strides = [1, 1]} : vector<32x128xf32> to vector<1x128xf32>
    %54 = vector.broadcast %52 : vector<8x1xf32> to vector<8x128xf32>
    %55 = vector.broadcast %53 : vector<1x128xf32> to vector<8x128xf32>
    %56 = arith.subf %54, %55 : vector<8x128xf32>
    %57 = math.absf %56 : vector<8x128xf32>
    %58 = arith.addf %51, %57 : vector<8x128xf32>
    %59 = vector.extract_strided_slice %0 {offsets = [0, 8], sizes = [8, 1], strides = [1, 1]} : vector<8x32xf32> to vector<8x1xf32>
    %60 = vector.extract_strided_slice %1 {offsets = [8, 0], sizes = [1, 128], strides = [1, 1]} : vector<32x128xf32> to vector<1x128xf32>
    %61 = vector.broadcast %59 : vector<8x1xf32> to vector<8x128xf32>
    %62 = vector.broadcast %60 : vector<1x128xf32> to vector<8x128xf32>
    %63 = arith.subf %61, %62 : vector<8x128xf32>
    %64 = math.absf %63 : vector<8x128xf32>
    %65 = arith.addf %58, %64 : vector<8x128xf32>
    %66 = vector.extract_strided_slice %0 {offsets = [0, 9], sizes = [8, 1], strides = [1, 1]} : vector<8x32xf32> to vector<8x1xf32>
    %67 = vector.extract_strided_slice %1 {offsets = [9, 0], sizes = [1, 128], strides = [1, 1]} : vector<32x128xf32> to vector<1x128xf32>
    %68 = vector.broadcast %66 : vector<8x1xf32> to vector<8x128xf32>
    %69 = vector.broadcast %67 : vector<1x128xf32> to vector<8x128xf32>
    %70 = arith.subf %68, %69 : vector<8x128xf32>
    %71 = math.absf %70 : vector<8x128xf32>
    %72 = arith.addf %65, %71 : vector<8x128xf32>
    %73 = vector.extract_strided_slice %0 {offsets = [0, 10], sizes = [8, 1], strides = [1, 1]} : vector<8x32xf32> to vector<8x1xf32>
    %74 = vector.extract_strided_slice %1 {offsets = [10, 0], sizes = [1, 128], strides = [1, 1]} : vector<32x128xf32> to vector<1x128xf32>
    %75 = vector.broadcast %73 : vector<8x1xf32> to vector<8x128xf32>
    %76 = vector.broadcast %74 : vector<1x128xf32> to vector<8x128xf32>
    %77 = arith.subf %75, %76 : vector<8x128xf32>
    %78 = math.absf %77 : vector<8x128xf32>
    %79 = arith.addf %72, %78 : vector<8x128xf32>
    %80 = vector.extract_strided_slice %0 {offsets = [0, 11], sizes = [8, 1], strides = [1, 1]} : vector<8x32xf32> to vector<8x1xf32>
    %81 = vector.extract_strided_slice %1 {offsets = [11, 0], sizes = [1, 128], strides = [1, 1]} : vector<32x128xf32> to vector<1x128xf32>
    %82 = vector.broadcast %80 : vector<8x1xf32> to vector<8x128xf32>
    %83 = vector.broadcast %81 : vector<1x128xf32> to vector<8x128xf32>
    %84 = arith.subf %82, %83 : vector<8x128xf32>
    %85 = math.absf %84 : vector<8x128xf32>
    %86 = arith.addf %79, %85 : vector<8x128xf32>
    %87 = vector.extract_strided_slice %0 {offsets = [0, 12], sizes = [8, 1], strides = [1, 1]} : vector<8x32xf32> to vector<8x1xf32>
    %88 = vector.extract_strided_slice %1 {offsets = [12, 0], sizes = [1, 128], strides = [1, 1]} : vector<32x128xf32> to vector<1x128xf32>
    %89 = vector.broadcast %87 : vector<8x1xf32> to vector<8x128xf32>
    %90 = vector.broadcast %88 : vector<1x128xf32> to vector<8x128xf32>
    %91 = arith.subf %89, %90 : vector<8x128xf32>
    %92 = math.absf %91 : vector<8x128xf32>
    %93 = arith.addf %86, %92 : vector<8x128xf32>
    %94 = vector.extract_strided_slice %0 {offsets = [0, 13], sizes = [8, 1], strides = [1, 1]} : vector<8x32xf32> to vector<8x1xf32>
    %95 = vector.extract_strided_slice %1 {offsets = [13, 0], sizes = [1, 128], strides = [1, 1]} : vector<32x128xf32> to vector<1x128xf32>
    %96 = vector.broadcast %94 : vector<8x1xf32> to vector<8x128xf32>
    %97 = vector.broadcast %95 : vector<1x128xf32> to vector<8x128xf32>
    %98 = arith.subf %96, %97 : vector<8x128xf32>
    %99 = math.absf %98 : vector<8x128xf32>
    %100 = arith.addf %93, %99 : vector<8x128xf32>
    %101 = vector.extract_strided_slice %0 {offsets = [0, 14], sizes = [8, 1], strides = [1, 1]} : vector<8x32xf32> to vector<8x1xf32>
    %102 = vector.extract_strided_slice %1 {offsets = [14, 0], sizes = [1, 128], strides = [1, 1]} : vector<32x128xf32> to vector<1x128xf32>
    %103 = vector.broadcast %101 : vector<8x1xf32> to vector<8x128xf32>
    %104 = vector.broadcast %102 : vector<1x128xf32> to vector<8x128xf32>
    %105 = arith.subf %103, %104 : vector<8x128xf32>
    %106 = math.absf %105 : vector<8x128xf32>
    %107 = arith.addf %100, %106 : vector<8x128xf32>
    %108 = vector.extract_strided_slice %0 {offsets = [0, 15], sizes = [8, 1], strides = [1, 1]} : vector<8x32xf32> to vector<8x1xf32>
    %109 = vector.extract_strided_slice %1 {offsets = [15, 0], sizes = [1, 128], strides = [1, 1]} : vector<32x128xf32> to vector<1x128xf32>
    %110 = vector.broadcast %108 : vector<8x1xf32> to vector<8x128xf32>
    %111 = vector.broadcast %109 : vector<1x128xf32> to vector<8x128xf32>
    %112 = arith.subf %110, %111 : vector<8x128xf32>
    %113 = math.absf %112 : vector<8x128xf32>
    %114 = arith.addf %107, %113 : vector<8x128xf32>
    %115 = vector.extract_strided_slice %0 {offsets = [0, 16], sizes = [8, 1], strides = [1, 1]} : vector<8x32xf32> to vector<8x1xf32>
    %116 = vector.extract_strided_slice %1 {offsets = [16, 0], sizes = [1, 128], strides = [1, 1]} : vector<32x128xf32> to vector<1x128xf32>
    %117 = vector.broadcast %115 : vector<8x1xf32> to vector<8x128xf32>
    %118 = vector.broadcast %116 : vector<1x128xf32> to vector<8x128xf32>
    %119 = arith.subf %117, %118 : vector<8x128xf32>
    %120 = math.absf %119 : vector<8x128xf32>
    %121 = arith.addf %114, %120 : vector<8x128xf32>
    %122 = vector.extract_strided_slice %0 {offsets = [0, 17], sizes = [8, 1], strides = [1, 1]} : vector<8x32xf32> to vector<8x1xf32>
    %123 = vector.extract_strided_slice %1 {offsets = [17, 0], sizes = [1, 128], strides = [1, 1]} : vector<32x128xf32> to vector<1x128xf32>
    %124 = vector.broadcast %122 : vector<8x1xf32> to vector<8x128xf32>
    %125 = vector.broadcast %123 : vector<1x128xf32> to vector<8x128xf32>
    %126 = arith.subf %124, %125 : vector<8x128xf32>
    %127 = math.absf %126 : vector<8x128xf32>
    %128 = arith.addf %121, %127 : vector<8x128xf32>
    %129 = vector.extract_strided_slice %0 {offsets = [0, 18], sizes = [8, 1], strides = [1, 1]} : vector<8x32xf32> to vector<8x1xf32>
    %130 = vector.extract_strided_slice %1 {offsets = [18, 0], sizes = [1, 128], strides = [1, 1]} : vector<32x128xf32> to vector<1x128xf32>
    %131 = vector.broadcast %129 : vector<8x1xf32> to vector<8x128xf32>
    %132 = vector.broadcast %130 : vector<1x128xf32> to vector<8x128xf32>
    %133 = arith.subf %131, %132 : vector<8x128xf32>
    %134 = math.absf %133 : vector<8x128xf32>
    %135 = arith.addf %128, %134 : vector<8x128xf32>
    %136 = vector.extract_strided_slice %0 {offsets = [0, 19], sizes = [8, 1], strides = [1, 1]} : vector<8x32xf32> to vector<8x1xf32>
    %137 = vector.extract_strided_slice %1 {offsets = [19, 0], sizes = [1, 128], strides = [1, 1]} : vector<32x128xf32> to vector<1x128xf32>
    %138 = vector.broadcast %136 : vector<8x1xf32> to vector<8x128xf32>
    %139 = vector.broadcast %137 : vector<1x128xf32> to vector<8x128xf32>
    %140 = arith.subf %138, %139 : vector<8x128xf32>
    %141 = math.absf %140 : vector<8x128xf32>
    %142 = arith.addf %135, %141 : vector<8x128xf32>
    %143 = vector.extract_strided_slice %0 {offsets = [0, 20], sizes = [8, 1], strides = [1, 1]} : vector<8x32xf32> to vector<8x1xf32>
    %144 = vector.extract_strided_slice %1 {offsets = [20, 0], sizes = [1, 128], strides = [1, 1]} : vector<32x128xf32> to vector<1x128xf32>
    %145 = vector.broadcast %143 : vector<8x1xf32> to vector<8x128xf32>
    %146 = vector.broadcast %144 : vector<1x128xf32> to vector<8x128xf32>
    %147 = arith.subf %145, %146 : vector<8x128xf32>
    %148 = math.absf %147 : vector<8x128xf32>
    %149 = arith.addf %142, %148 : vector<8x128xf32>
    %150 = vector.extract_strided_slice %0 {offsets = [0, 21], sizes = [8, 1], strides = [1, 1]} : vector<8x32xf32> to vector<8x1xf32>
    %151 = vector.extract_strided_slice %1 {offsets = [21, 0], sizes = [1, 128], strides = [1, 1]} : vector<32x128xf32> to vector<1x128xf32>
    %152 = vector.broadcast %150 : vector<8x1xf32> to vector<8x128xf32>
    %153 = vector.broadcast %151 : vector<1x128xf32> to vector<8x128xf32>
    %154 = arith.subf %152, %153 : vector<8x128xf32>
    %155 = math.absf %154 : vector<8x128xf32>
    %156 = arith.addf %149, %155 : vector<8x128xf32>
    %157 = vector.extract_strided_slice %0 {offsets = [0, 22], sizes = [8, 1], strides = [1, 1]} : vector<8x32xf32> to vector<8x1xf32>
    %158 = vector.extract_strided_slice %1 {offsets = [22, 0], sizes = [1, 128], strides = [1, 1]} : vector<32x128xf32> to vector<1x128xf32>
    %159 = vector.broadcast %157 : vector<8x1xf32> to vector<8x128xf32>
    %160 = vector.broadcast %158 : vector<1x128xf32> to vector<8x128xf32>
    %161 = arith.subf %159, %160 : vector<8x128xf32>
    %162 = math.absf %161 : vector<8x128xf32>
    %163 = arith.addf %156, %162 : vector<8x128xf32>
    %164 = vector.extract_strided_slice %0 {offsets = [0, 23], sizes = [8, 1], strides = [1, 1]} : vector<8x32xf32> to vector<8x1xf32>
    %165 = vector.extract_strided_slice %1 {offsets = [23, 0], sizes = [1, 128], strides = [1, 1]} : vector<32x128xf32> to vector<1x128xf32>
    %166 = vector.broadcast %164 : vector<8x1xf32> to vector<8x128xf32>
    %167 = vector.broadcast %165 : vector<1x128xf32> to vector<8x128xf32>
    %168 = arith.subf %166, %167 : vector<8x128xf32>
    %169 = math.absf %168 : vector<8x128xf32>
    %170 = arith.addf %163, %169 : vector<8x128xf32>
    %171 = vector.extract_strided_slice %0 {offsets = [0, 24], sizes = [8, 1], strides = [1, 1]} : vector<8x32xf32> to vector<8x1xf32>
    %172 = vector.extract_strided_slice %1 {offsets = [24, 0], sizes = [1, 128], strides = [1, 1]} : vector<32x128xf32> to vector<1x128xf32>
    %173 = vector.broadcast %171 : vector<8x1xf32> to vector<8x128xf32>
    %174 = vector.broadcast %172 : vector<1x128xf32> to vector<8x128xf32>
    %175 = arith.subf %173, %174 : vector<8x128xf32>
    %176 = math.absf %175 : vector<8x128xf32>
    %177 = arith.addf %170, %176 : vector<8x128xf32>
    %178 = vector.extract_strided_slice %0 {offsets = [0, 25], sizes = [8, 1], strides = [1, 1]} : vector<8x32xf32> to vector<8x1xf32>
    %179 = vector.extract_strided_slice %1 {offsets = [25, 0], sizes = [1, 128], strides = [1, 1]} : vector<32x128xf32> to vector<1x128xf32>
    %180 = vector.broadcast %178 : vector<8x1xf32> to vector<8x128xf32>
    %181 = vector.broadcast %179 : vector<1x128xf32> to vector<8x128xf32>
    %182 = arith.subf %180, %181 : vector<8x128xf32>
    %183 = math.absf %182 : vector<8x128xf32>
    %184 = arith.addf %177, %183 : vector<8x128xf32>
    %185 = vector.extract_strided_slice %0 {offsets = [0, 26], sizes = [8, 1], strides = [1, 1]} : vector<8x32xf32> to vector<8x1xf32>
    %186 = vector.extract_strided_slice %1 {offsets = [26, 0], sizes = [1, 128], strides = [1, 1]} : vector<32x128xf32> to vector<1x128xf32>
    %187 = vector.broadcast %185 : vector<8x1xf32> to vector<8x128xf32>
    %188 = vector.broadcast %186 : vector<1x128xf32> to vector<8x128xf32>
    %189 = arith.subf %187, %188 : vector<8x128xf32>
    %190 = math.absf %189 : vector<8x128xf32>
    %191 = arith.addf %184, %190 : vector<8x128xf32>
    %192 = vector.extract_strided_slice %0 {offsets = [0, 27], sizes = [8, 1], strides = [1, 1]} : vector<8x32xf32> to vector<8x1xf32>
    %193 = vector.extract_strided_slice %1 {offsets = [27, 0], sizes = [1, 128], strides = [1, 1]} : vector<32x128xf32> to vector<1x128xf32>
    %194 = vector.broadcast %192 : vector<8x1xf32> to vector<8x128xf32>
    %195 = vector.broadcast %193 : vector<1x128xf32> to vector<8x128xf32>
    %196 = arith.subf %194, %195 : vector<8x128xf32>
    %197 = math.absf %196 : vector<8x128xf32>
    %198 = arith.addf %191, %197 : vector<8x128xf32>
    %199 = vector.extract_strided_slice %0 {offsets = [0, 28], sizes = [8, 1], strides = [1, 1]} : vector<8x32xf32> to vector<8x1xf32>
    %200 = vector.extract_strided_slice %1 {offsets = [28, 0], sizes = [1, 128], strides = [1, 1]} : vector<32x128xf32> to vector<1x128xf32>
    %201 = vector.broadcast %199 : vector<8x1xf32> to vector<8x128xf32>
    %202 = vector.broadcast %200 : vector<1x128xf32> to vector<8x128xf32>
    %203 = arith.subf %201, %202 : vector<8x128xf32>
    %204 = math.absf %203 : vector<8x128xf32>
    %205 = arith.addf %198, %204 : vector<8x128xf32>
    %206 = vector.extract_strided_slice %0 {offsets = [0, 29], sizes = [8, 1], strides = [1, 1]} : vector<8x32xf32> to vector<8x1xf32>
    %207 = vector.extract_strided_slice %1 {offsets = [29, 0], sizes = [1, 128], strides = [1, 1]} : vector<32x128xf32> to vector<1x128xf32>
    %208 = vector.broadcast %206 : vector<8x1xf32> to vector<8x128xf32>
    %209 = vector.broadcast %207 : vector<1x128xf32> to vector<8x128xf32>
    %210 = arith.subf %208, %209 : vector<8x128xf32>
    %211 = math.absf %210 : vector<8x128xf32>
    %212 = arith.addf %205, %211 : vector<8x128xf32>
    %213 = vector.extract_strided_slice %0 {offsets = [0, 30], sizes = [8, 1], strides = [1, 1]} : vector<8x32xf32> to vector<8x1xf32>
    %214 = vector.extract_strided_slice %1 {offsets = [30, 0], sizes = [1, 128], strides = [1, 1]} : vector<32x128xf32> to vector<1x128xf32>
    %215 = vector.broadcast %213 : vector<8x1xf32> to vector<8x128xf32>
    %216 = vector.broadcast %214 : vector<1x128xf32> to vector<8x128xf32>
    %217 = arith.subf %215, %216 : vector<8x128xf32>
    %218 = math.absf %217 : vector<8x128xf32>
    %219 = arith.addf %212, %218 : vector<8x128xf32>
    %220 = vector.extract_strided_slice %0 {offsets = [0, 31], sizes = [8, 1], strides = [1, 1]} : vector<8x32xf32> to vector<8x1xf32>
    %221 = vector.extract_strided_slice %1 {offsets = [31, 0], sizes = [1, 128], strides = [1, 1]} : vector<32x128xf32> to vector<1x128xf32>
    %222 = vector.broadcast %220 : vector<8x1xf32> to vector<8x128xf32>
    %223 = vector.broadcast %221 : vector<1x128xf32> to vector<8x128xf32>
    %224 = arith.subf %222, %223 : vector<8x128xf32>
    %225 = math.absf %224 : vector<8x128xf32>
    %226 = arith.addf %219, %225 : vector<8x128xf32>
    %c0_3 = arith.constant 0 : index
    %c0_4 = arith.constant 0 : index
    %227 = vector.load %arg4[%c0_3, %c0_4] : memref<8x128xf32, #tpu.memory_space<vmem>>, vector<8x128xf32>
    tpu.vector_store %arg4[%c0_3, %c0_4], %226 {strides = array<i32>} : memref<8x128xf32, #tpu.memory_space<vmem>>, vector<8x128xf32>,
    return
  }
  func.func @transform_0(%arg0: i32, %arg1: i32) -> (i32, i32) {
    %c0_i32 = arith.constant 0 : i32
    %c0_i32_0 = arith.constant 0 : i32
    return %arg1, %c0_i32 : i32, i32
  }
  func.func @transform_1(%arg0: i32, %arg1: i32) -> (i32, i32) {
    %c0_i32 = arith.constant 0 : i32
    %c0_i32_0 = arith.constant 0 : i32
    return %c0_i32, %arg0 : i32, i32
  }
  func.func @transform_2(%arg0: i32, %arg1: i32) -> (i32, i32) {
    %c0_i32 = arith.constant 0 : i32
    return %arg1, %arg0 : i32, i32
  }
}

</mosaic_0001>

<bundles_post_ra>
// kernel: tpu_custom_call.1
= control target key start
LH: loop header
LB: loop body
LE: loop exit
PB: predicated region body
PF: predicated region fallthrough
CT: control target
= control target key end

     0   :  { %7 = vsyncpa [#allocation3], 0  ;;  %s732_s0 = inlined_call_operand.hbm [shape: f32[8,32], index: 0, kind: input, shape index: {}]   ;;  %s733_s1 = inlined_call_operand.hbm [shape: f32[32,128], index: 1, kind: input, shape index: {}]   ;;  %s734_s2 = inlined_call_operand.hbm [shape: f32[8,128], index: 2, kind: output, shape index: {}]  }
   0x1   :  { %8 = vsyncpa [#allocation6], 0 }
   0x2   :  { %9 = vsyncpa [#allocation4], 0  ;;  %s555_s9 = smov [#allocation2]   ;;  %s556_s11 = smov [#allocation5]  }
   0x3   :  { %s16_s10 = sshll.u32 %s555_s9, 4  ;;  %s25_s12 = sshll.u32 %s556_s11, 4  ;;  %s17_s10 = int_to_ptr.vmem [resolvable:$true] %s16_s10  ;;  %s607_s12 = int_to_ptr.vmem [resolvable:$true] %s25_s12 }
   0x4   :  { %s483_s15 = scalar_lea.hbm %s732_s0, 128 }
   0x5   :  { %p484_p0 = scmp.ne.s32.totalorder %s732_s0, %s483_s15  ;;  %p487_p1 = scmp.lt.u32.totalorder %s483_s15, %s732_s0 }
   0x7   :  { %p489_p2 = pnand %p487_p1, %p484_p0 }
   0x9   :  { %492 = shalt.err (!%p489_p2)
}
   0xa   :  { %s493_s20 = scalar_lea.vmem %s17_s10, 128  ;;  %p498_p4 = scmp.lt.s32.totalorder %s17_s10, %s17_s10 }
   0xb   :  { %p494_p3 = scmp.ne.s32.totalorder %s17_s10, %s493_s20  ;;  %p499_p5 = scmp.lt.s32.totalorder %s493_s20, %s493_s20 }
   0xd   :  { %p500_p6 = por %p499_p5, %p498_p4 }
   0xf   :  { %p501_p7 = pnand %p500_p6, %p494_p3 }
  0x11   :  { %504 = shalt.err (!%p501_p7)
}
  0x12   :  { %19 = dma.hbm_to_vmem [thread:$0]  %s732_s0, 128, %s17_s10, [#allocation3]  }
  0x13   :  { %s505_s25 = scalar_lea.hbm %s733_s1, 512 }
  0x14   :  { %p506_p8 = scmp.ne.s32.totalorder %s733_s1, %s505_s25  ;;  %p509_p9 = scmp.lt.u32.totalorder %s505_s25, %s733_s1 }
  0x16   :  { %p511_p10 = pnand %p509_p9, %p506_p8 }
  0x18   :  { %514 = shalt.err (!%p511_p10)
}
  0x19   :  { %s515_s30 = scalar_lea.vmem %s607_s12, 512  ;;  %p520_p12 = scmp.lt.s32.totalorder %s607_s12, %s607_s12 }
  0x1a   :  { %p516_p11 = scmp.ne.s32.totalorder %s607_s12, %s515_s30  ;;  %p521_p13 = scmp.lt.s32.totalorder %s515_s30, %s515_s30 }
  0x1c   :  { %p522_p0 = por %p521_p13, %p520_p12 }
  0x1e   :  { %p523_p1 = pnand %p522_p0, %p516_p11 }
  0x20   :  { %526 = shalt.err (!%p523_p1)
}
  0x21   :  { %s557_s0 = smov 128   ;;  %s558_s3 = smov 8  }
  0x22   :  { %31 = dma.hbm_to_vmem [thread:$0]  %s733_s1, 512, %s607_s12, [#allocation6], %s557_s0, %s557_s0, %s558_s3  }
  0x23   :  { %549 = dma.done.wait [#allocation3], 128  }
  0x24   :  { %550 = vsyncadd [#allocation3], 4294967168 }
  0x25   :  { %551 = dma.done.wait [#allocation6], 512  }
  0x26   :  { %552 = vsyncadd [#allocation6], 4294966784  ;;  %v559_v0 = vmov 2   ;;  %v560_v1 = vmov 0   ;;  %v638_v2 = vld [vmem:[#allocation2] sm:$0xff]  ;;  %v561_v3 = vmov 3   ;;  %v48_v33 = vlaneseq }
  0x27   :  { %452 = vset.pattern.permute.xlu1 %v559_v0  ;;  %450 = vset.pattern.permute.xlu0 %v560_v1  ;;  %v562_v4 = vmov 1   ;;  %v563_v5 = vmov 4   ;;  %v564_v6 = vmov 5   ;;  %v565_v7 = vmov 6   ;;  %v39_v36 = vld [vmem:[#allocation5] sm:$0xff]  ;;  %s591_s1 = smov [#allocation7]  }
  0x28   :  { %67 = vperm.xlu1 %452, %v638_v2   ;;  %45 = vperm.xlu0 %450, %v638_v2   ;;  %v566_v8 = vmov 8   ;;  %v567_v9 = vmov 7   ;;  %v568_v10 = vmov 11   ;;  %v569_v11 = vmov 9   ;;  %s403_s6 = sshll.u32 %s591_s1, 4  ;;  %s404_s6 = int_to_ptr.vmem [resolvable:$true] %s403_s6 }
  0x29   :  { %v570_v12 = vmov 14   ;;  %v571_v13 = vmov 10   ;;  %v572_v14 = vmov 17   ;;  %v573_v15 = vmov 12   ;;  %s527_s7 = scalar_lea.vmem %s404_s6, 128  ;;  %p532_p3 = scmp.lt.s32.totalorder %s404_s6, %s404_s6 }
  0x2a   :  { %v574_v16 = vmov 20   ;;  %v575_v17 = vmov 13   ;;  %v576_v18 = vmov 23   ;;  %v577_v19 = vmov 15   ;;  %p528_p2 = scmp.ne.s32.totalorder %s404_s6, %s527_s7  ;;  %p533_p4 = scmp.lt.s32.totalorder %s527_s7, %s527_s7 }
  0x2b   :  { %v578_v20 = vmov 26   ;;  %v579_v21 = vmov 16   ;;  %v580_v22 = vmov 29   ;;  %v581_v23 = vmov 18  }
  0x2c   :  { %453 = vset.pattern.permute.xlu1 %v561_v3  ;;  %451 = vset.pattern.permute.xlu0 %v562_v4  ;;  %v582_v24 = vmov 31   ;;  %v583_v25 = vmov 19   ;;  %v584_v26 = vmov 21   ;;  %v585_v27 = vmov 22   ;;  %p534_p5 = por %p533_p4, %p532_p3 }
  0x2d   :  { %78 = vperm.xlu1 %453, %v638_v2   ;;  %56 = vperm.xlu0 %451, %v638_v2   ;;  %v586_v28 = vmov 24   ;;  %v587_v29 = vmov 25   ;;  %v588_v30 = vmov 27   ;;  %v589_v31 = vmov 28  }
  0x2e   :  { %v590_v32 = vmov 30   ;;  %v49_v34 = vshrl.u32 %v48_v33, 7  ;;  %p535_p6 = pnand %p534_p5, %p528_p2 }
  0x30   :  { %v672_v35 = vsub.s32 0, %v49_v34  ;;  %v674_v37 = vsub.s32 2, %v49_v34  ;;  %v677_v39 = vsub.s32 1, %v49_v34  ;;  %v679_v42 = vsub.s32 3, %v49_v34 }
  0x31   :  { %454 = vset.pattern.permute.xlu1 %v563_v5  ;;  %455 = vset.pattern.permute.xlu0 %v564_v6  ;;  %v683_v46 = vsub.s32 4, %v49_v34  ;;  %v685_v47 = vsub.s32 5, %v49_v34  ;;  %v690_v58 = vsub.s32 6, %v49_v34  ;;  %v693_v5 = vsub.s32 7, %v49_v34 }
  0x32   :  { %89 = vperm.xlu1 %454, %v638_v2   ;;  %100 = vperm.xlu0 %455, %v638_v2   ;;  %v51_v38 = vrot.slane %v39_v36, %v672_v35  ;;  %v73_v43 = vrot.slane %v39_v36, %v674_v37  ;;  %v62_v45 = vrot.slane %v39_v36, %v677_v39 }
  0x33   :  { %v84_v48 = vrot.slane %v39_v36, %v679_v42  ;;  %v95_v54 = vrot.slane %v39_v36, %v683_v46  ;;  %v106_v55 = vrot.slane %v39_v36, %v685_v47  ;;  %v117_v3 = vrot.slane %v39_v36, %v690_v58 }
  0x36   :  { %456 = vset.pattern.permute.xlu1 %v565_v7  ;;  %458 = vset.pattern.permute.xlu0 %v566_v8  ;;  %v40_v7 = vld [vmem:[#allocation5 + $0x8] sm:$0xff] }
  0x37   :  { %111 = vperm.xlu1 %456, %v638_v2   ;;  %133 = vperm.xlu0 %458, %v638_v2  }
  0x3b   :  { %457 = vset.pattern.permute.xlu1 %v567_v9  ;;  %461 = vset.pattern.permute.xlu0 %v568_v10 }
  0x3c   :  { %122 = vperm.xlu1 %457, %v638_v2   ;;  %166 = vperm.xlu0 %461, %v638_v2  }
  0x40   :  { %459 = vset.pattern.permute.xlu1 %v569_v11  ;;  %464 = vset.pattern.permute.xlu0 %v570_v12  ;;  %v128_v12 = vrot.slane %v39_v36, %v693_v5  ;;  %v183_v36 = vrot.slane %v40_v7, %v683_v46 }
  0x41   :  { %144 = vperm.xlu1 %459, %v638_v2   ;;  %199 = vperm.xlu0 %464, %v638_v2  }
  0x45   :  { %460 = vset.pattern.permute.xlu1 %v571_v13  ;;  %467 = vset.pattern.permute.xlu0 %v572_v14  ;;  %v139_v13 = vrot.slane %v40_v7, %v672_v35 }
  0x46   :  { %155 = vperm.xlu1 %460, %v638_v2   ;;  %232 = vperm.xlu0 %467, %v638_v2  }
  0x4a   :  { %462 = vset.pattern.permute.xlu1 %v573_v15  ;;  %470 = vset.pattern.permute.xlu0 %v574_v16 }
  0x4b   :  { %177 = vperm.xlu1 %462, %v638_v2   ;;  %265 = vperm.xlu0 %470, %v638_v2  }
  0x4f   :  { %463 = vset.pattern.permute.xlu1 %v575_v17  ;;  %473 = vset.pattern.permute.xlu0 %v576_v18 }
  0x50   :  { %188 = vperm.xlu1 %463, %v638_v2   ;;  %298 = vperm.xlu0 %473, %v638_v2  }
  0x54   :  { %465 = vset.pattern.permute.xlu1 %v577_v19  ;;  %476 = vset.pattern.permute.xlu0 %v578_v20  ;;  %v150_v20 = vrot.slane %v40_v7, %v677_v39 }
  0x55   :  { %210 = vperm.xlu1 %465, %v638_v2   ;;  %331 = vperm.xlu0 %476, %v638_v2  }
  0x59   :  { %466 = vset.pattern.permute.xlu1 %v579_v21  ;;  %479 = vset.pattern.permute.xlu0 %v580_v22 }
  0x5a   :  { %221 = vperm.xlu1 %466, %v638_v2   ;;  %364 = vperm.xlu0 %479, %v638_v2  }
  0x5e   :  { %468 = vset.pattern.permute.xlu1 %v581_v23  ;;  %482 = vset.pattern.permute.xlu0 %v582_v24 }
  0x5f   :  { %243 = vperm.xlu1 %468, %v638_v2  }
  0x63   :  { %469 = vset.pattern.permute.xlu1 %v583_v25 }
  0x64   :  { %254 = vperm.xlu1 %469, %v638_v2  }
  0x68   :  { %471 = vset.pattern.permute.xlu1 %v584_v26 }
  0x69   :  { %276 = vperm.xlu1 %471, %v638_v2  }
  0x6d   :  { %472 = vset.pattern.permute.xlu1 %v585_v27  ;;  %v161_v27 = vrot.slane %v40_v7, %v674_v37 }
  0x6e   :  { %287 = vperm.xlu1 %472, %v638_v2  }
  0x72   :  { %474 = vset.pattern.permute.xlu1 %v586_v28  ;;  %v172_v28 = vrot.slane %v40_v7, %v679_v42 }
  0x73   :  { %309 = vperm.xlu1 %474, %v638_v2  }
  0x77   :  { %475 = vset.pattern.permute.xlu1 %v587_v29 }
  0x78   :  { %320 = vperm.xlu1 %475, %v638_v2  }
  0x7c   :  { %477 = vset.pattern.permute.xlu1 %v588_v30 }
  0x7d   :  { %342 = vperm.xlu1 %477, %v638_v2  }
  0x81   :  { %478 = vset.pattern.permute.xlu1 %v589_v31 }
  0x82   :  { %353 = vperm.xlu1 %478, %v638_v2  }
  0x86   :  { %480 = vset.pattern.permute.xlu1 %v590_v32 }
  0x87   :  { %375 = vperm.xlu1 %480, %v638_v2  }
  0x8b   :  { %481 = vset.pattern.permute.xlu1 %v582_v24 }
  0x8c   :  { %386 = vperm.xlu1 %481, %v638_v2  }
  0xa7   :  { %v68_v40 = vpop.permute.xlu1 %67  ;;  %v46_v41 = vpop.permute.xlu0 %45 }
  0xa8   :  { %v52_v44 = vsub.f32 %v46_v41, %v51_v38  ;;  %v74_v51 = vsub.f32 %v68_v40, %v73_v43 }
  0xaa   :  { %v53_v52 = vand.u32 2147483647, %v52_v44  ;;  %v75_v59 = vand.u32 2147483647, %v74_v51 }
  0xac   :  { %v79_v49 = vpop.permute.xlu1 %78  ;;  %v57_v50 = vpop.permute.xlu0 %56 }
  0xad   :  { %v63_v53 = vsub.f32 %v57_v50, %v62_v45  ;;  %v85_v56 = vsub.f32 %v79_v49, %v84_v48  ;;  %v194_v48 = vrot.slane %v40_v7, %v685_v47  ;;  %v205_v49 = vrot.slane %v40_v7, %v690_v58 }
  0xaf   :  { %v64_v57 = vand.u32 2147483647, %v63_v53  ;;  %v86_v1 = vand.u32 2147483647, %v85_v56  ;;  %v216_v56 = vrot.slane %v40_v7, %v693_v5 }
  0xb1   :  { %v65_v60 = vadd.f32 %v64_v57, %v53_v52  ;;  %v90_v61 = vpop.permute.xlu1 %89  ;;  %v101_v62 = vpop.permute.xlu0 %100 }
  0xb2   :  { %v96_v63 = vsub.f32 %v90_v61, %v95_v54  ;;  %v107_v0 = vsub.f32 %v101_v62, %v106_v55 }
  0xb3   :  { %v76_v2 = vadd.f32 %v75_v59, %v65_v60  ;;  %v41_v60 = vld [vmem:[#allocation5 + $0x10] sm:$0xff] }
  0xb4   :  { %v97_v4 = vand.u32 2147483647, %v96_v63  ;;  %v108_v8 = vand.u32 2147483647, %v107_v0 }
  0xb5   :  { %v87_v6 = vadd.f32 %v86_v1, %v76_v2  ;;  %v227_v1 = vrot.slane %v41_v60, %v672_v35  ;;  %v238_v2 = vrot.slane %v41_v60, %v677_v39 }
  0xb6   :  { %v112_v9 = vpop.permute.xlu1 %111  ;;  %v134_v14 = vpop.permute.xlu0 %133 }
  0xb7   :  { %v98_v10 = vadd.f32 %v97_v4, %v87_v6  ;;  %v118_v11 = vsub.f32 %v112_v9, %v117_v3  ;;  %v140_v19 = vsub.f32 %v134_v14, %v139_v13 }
  0xb9   :  { %v109_v15 = vadd.f32 %v108_v8, %v98_v10  ;;  %v119_v16 = vand.u32 2147483647, %v118_v11  ;;  %v141_v24 = vand.u32 2147483647, %v140_v19  ;;  %v249_v11 = vrot.slane %v41_v60, %v674_v37 }
  0xbb   :  { %v123_v17 = vpop.permute.xlu1 %122  ;;  %v120_v21 = vadd.f32 %v119_v16, %v109_v15  ;;  %v167_v29 = vpop.permute.xlu0 %166 }
  0xbc   :  { %v129_v18 = vsub.f32 %v123_v17, %v128_v12  ;;  %v173_v34 = vsub.f32 %v167_v29, %v172_v28  ;;  %v260_v17 = vrot.slane %v41_v60, %v679_v42 }
  0xbe   :  { %v130_v22 = vand.u32 2147483647, %v129_v18  ;;  %v174_v43 = vand.u32 2147483647, %v173_v34  ;;  %v271_v18 = vrot.slane %v41_v60, %v683_v46 }
  0xc0   :  { %v131_v23 = vadd.f32 %v130_v22, %v120_v21  ;;  %v145_v25 = vpop.permute.xlu1 %144  ;;  %v200_v50 = vpop.permute.xlu0 %199 }
  0xc1   :  { %v151_v26 = vsub.f32 %v145_v25, %v150_v20  ;;  %v206_v55 = vsub.f32 %v200_v50, %v205_v49  ;;  %v282_v25 = vrot.slane %v41_v60, %v685_v47 }
  0xc2   :  { %v142_v30 = vadd.f32 %v141_v24, %v131_v23 }
  0xc3   :  { %v152_v31 = vand.u32 2147483647, %v151_v26  ;;  %v207_v62 = vand.u32 2147483647, %v206_v55 }
  0xc5   :  { %v156_v32 = vpop.permute.xlu1 %155  ;;  %v153_v38 = vadd.f32 %v152_v31, %v142_v30  ;;  %v233_v3 = vpop.permute.xlu0 %232 }
  0xc6   :  { %v162_v33 = vsub.f32 %v156_v32, %v161_v27  ;;  %v239_v10 = vsub.f32 %v233_v3, %v238_v2  ;;  %v293_v32 = vrot.slane %v41_v60, %v690_v58 }
  0xc8   :  { %v163_v40 = vand.u32 2147483647, %v162_v33  ;;  %v240_v14 = vand.u32 2147483647, %v239_v10  ;;  %v304_v33 = vrot.slane %v41_v60, %v693_v5 }
  0xca   :  { %v164_v41 = vadd.f32 %v163_v40, %v153_v38  ;;  %v178_v44 = vpop.permute.xlu1 %177  ;;  %v266_v19 = vpop.permute.xlu0 %265  ;;  %v42_v40 = vld [vmem:[#allocation5 + $0x18] sm:$0xff] }
  0xcb   :  { %v184_v45 = vsub.f32 %v178_v44, %v183_v36  ;;  %v272_v24 = vsub.f32 %v266_v19, %v271_v18  ;;  %v337_v55 = vrot.slane %v42_v40, %v674_v37  ;;  %v392_v18 = vrot.slane %v42_v40, %v693_v5 }
  0xcc   :  { %v175_v51 = vadd.f32 %v174_v43, %v164_v41 }
  0xcd   :  { %v185_v52 = vand.u32 2147483647, %v184_v45  ;;  %v273_v29 = vand.u32 2147483647, %v272_v24  ;;  %v315_v45 = vrot.slane %v42_v40, %v672_v35 }
  0xcf   :  { %v189_v53 = vpop.permute.xlu1 %188  ;;  %v186_v57 = vadd.f32 %v185_v52, %v175_v51  ;;  %v299_v34 = vpop.permute.xlu0 %298 }
  0xd0   :  { %v195_v54 = vsub.f32 %v189_v53, %v194_v48  ;;  %v305_v44 = vsub.f32 %v299_v34, %v304_v33 }
  0xd2   :  { %v196_v59 = vand.u32 2147483647, %v195_v54  ;;  %v306_v51 = vand.u32 2147483647, %v305_v44  ;;  %v326_v54 = vrot.slane %v42_v40, %v677_v39  ;;  %v370_v39 = vrot.slane %v42_v40, %v685_v47 }
  0xd4   :  { %v197_v61 = vadd.f32 %v196_v59, %v186_v57  ;;  %v211_v63 = vpop.permute.xlu1 %210 }
  0xd5   :  { %v217_v0 = vsub.f32 %v211_v63, %v216_v56  ;;  %v332_v56 = vpop.permute.xlu0 %331  ;;  %v348_v63 = vrot.slane %v42_v40, %v679_v42 }
  0xd6   :  { %v208_v4 = vadd.f32 %v207_v62, %v197_v61  ;;  %v338_v62 = vsub.f32 %v332_v56, %v337_v55 }
  0xd7   :  { %v218_v6 = vand.u32 2147483647, %v217_v0 }
  0xd8   :  { %v339_v2 = vand.u32 2147483647, %v338_v62 }
  0xd9   :  { %v222_v8 = vpop.permute.xlu1 %221  ;;  %v219_v7 = vadd.f32 %v218_v6, %v208_v4  ;;  %v359_v6 = vrot.slane %v42_v40, %v683_v46 }
  0xda   :  { %v228_v9 = vsub.f32 %v222_v8, %v227_v1  ;;  %v365_v8 = vpop.permute.xlu0 %364 }
  0xdc   :  { %v229_v12 = vand.u32 2147483647, %v228_v9 }
  0xde   :  { %v230_v13 = vadd.f32 %v229_v12, %v219_v7  ;;  %v244_v15 = vpop.permute.xlu1 %243  ;;  %v371_v7 = vsub.f32 %v365_v8, %v370_v39  ;;  %v381_v12 = vrot.slane %v42_v40, %v690_v58 }
  0xdf   :  { %v250_v16 = vsub.f32 %v244_v15, %v249_v11 }
  0xe0   :  { %v241_v20 = vadd.f32 %v240_v14, %v230_v13  ;;  %v372_v15 = vand.u32 2147483647, %v371_v7 }
  0xe1   :  { %v251_v21 = vand.u32 2147483647, %v250_v16 }
  0xe3   :  { %v255_v22 = vpop.permute.xlu1 %254  ;;  %v252_v26 = vadd.f32 %v251_v21, %v241_v20 }
  0xe4   :  { %v261_v23 = vsub.f32 %v255_v22, %v260_v17 }
  0xe6   :  { %v262_v27 = vand.u32 2147483647, %v261_v23 }
  0xe8   :  { %v263_v28 = vadd.f32 %v262_v27, %v252_v26  ;;  %v277_v30 = vpop.permute.xlu1 %276 }
  0xe9   :  { %v283_v31 = vsub.f32 %v277_v30, %v282_v25 }
  0xea   :  { %v274_v36 = vadd.f32 %v273_v29, %v263_v28 }
  0xeb   :  { %v284_v38 = vand.u32 2147483647, %v283_v31 }
  0xed   :  { %v288_v41 = vpop.permute.xlu1 %287  ;;  %v285_v48 = vadd.f32 %v284_v38, %v274_v36 }
  0xee   :  { %v294_v43 = vsub.f32 %v288_v41, %v293_v32 }
  0xf0   :  { %v295_v49 = vand.u32 2147483647, %v294_v43 }
  0xf2   :  { %v296_v50 = vadd.f32 %v295_v49, %v285_v48  ;;  %v310_v52 = vpop.permute.xlu1 %309 }
  0xf3   :  { %v316_v53 = vsub.f32 %v310_v52, %v315_v45 }
  0xf4   :  { %v307_v57 = vadd.f32 %v306_v51, %v296_v50 }
  0xf5   :  { %v317_v59 = vand.u32 2147483647, %v316_v53 }
  0xf7   :  { %v321_v60 = vpop.permute.xlu1 %320  ;;  %v318_v0 = vadd.f32 %v317_v59, %v307_v57 }
  0xf8   :  { %v327_v61 = vsub.f32 %v321_v60, %v326_v54 }
  0xfa   :  { %v328_v35 = vand.u32 2147483647, %v327_v61 }
  0xfc   :  { %v329_v1 = vadd.f32 %v328_v35, %v318_v0  ;;  %v343_v3 = vpop.permute.xlu1 %342 }
  0xfd   :  { %v349_v4 = vsub.f32 %v343_v3, %v348_v63 }
  0xfe   :  { %v340_v37 = vadd.f32 %v339_v2, %v329_v1 }
  0xff   :  { %v350_v9 = vand.u32 2147483647, %v349_v4 }
 0x101   :  { %v354_v10 = vpop.permute.xlu1 %353  ;;  %v351_v13 = vadd.f32 %v350_v9, %v340_v37 }
 0x102   :  { %v360_v11 = vsub.f32 %v354_v10, %v359_v6 }
 0x104   :  { %v361_v42 = vand.u32 2147483647, %v360_v11 }
 0x106   :  { %v362_v14 = vadd.f32 %v361_v42, %v351_v13  ;;  %v376_v16 = vpop.permute.xlu1 %375 }
 0x107   :  { %v382_v17 = vsub.f32 %v376_v16, %v381_v12 }
 0x108   :  { %v373_v19 = vadd.f32 %v372_v15, %v362_v14 }
 0x109   :  { %v383_v46 = vand.u32 2147483647, %v382_v17 }
 0x10b   :  { %v387_v20 = vpop.permute.xlu1 %386  ;;  %v384_v21 = vadd.f32 %v383_v46, %v373_v19 }
 0x10c   :  { %v393_v47 = vsub.f32 %v387_v20, %v392_v18 }
 0x10e   :  { %v394_v22 = vand.u32 2147483647, %v393_v47 }
 0x110   :  { %v395_v23 = vadd.f32 %v394_v22, %v384_v21 }
 0x112   :  { %396 = vst [vmem:[#allocation7] sm:$0xff] %v395_v23 }
 0x113   :  { %538 = shalt.err (!%p535_p6)
}
 0x114   :  { %s539_s10 = scalar_lea.hbm %s734_s2, 128 }
 0x115   :  { %p540_p7 = scmp.ne.s32.totalorder %s734_s2, %s539_s10  ;;  %p543_p8 = scmp.lt.u32.totalorder %s539_s10, %s734_s2 }
 0x117   :  { %p545_p9 = pnand %p543_p8, %p540_p7 }
 0x119   :  { %548 = shalt.err (!%p545_p9)
}
 0x11a   :  { %406 = dma.vmem_to_hbm [thread:$0]  %s404_s6, 128, %s734_s2, [#allocation4]  }
 0x11b   :  { %553 = dma.done.wait [#allocation4], 128  }
 0x11c   :  { %554 = vsyncadd [#allocation4], 4294967168 }
 0x11d   :  { %410 = vsyncpa [#allocation3], 1 }
 0x11e   :  { %411 = vsyncpa [#allocation6], 1 }
 0x11f   :  { %412 = vsyncpa [#allocation4], 1 }

</bundles_post_ra>
